<compile_context>
chip_gen: v5e
topology: v5e:2x2
jax: 0.10.0
libtpu: 0.0.40
codegen_flags: <defaults>
</compile_context>

<pallas_src>
import numpy as np
import jax
import jax.numpy as jnp
from jax.experimental import pallas as pl
from jax.experimental.pallas import tpu as pltpu


# ---------------------------------------------------------------------------
# Tuning knobs
# ---------------------------------------------------------------------------
_LANE_PACK = 2          # 8x8 blocks packed per row -> 128 lanes (use 4 -> 256
                        # lanes to natively fill the v6e/v7x 256-wide MXU).
_TILE_ROWS = 1024       # rows per grid step: 1024*128*4B = 512 KiB per buffer.
_SMALL_BATCH_THRESHOLD = 512   # below this, pure-JAX path beats kernel launch.


def _round_up(x: int, m: int) -> int:
    return ((x + m - 1) // m) * m


def _make_params():
    """Deterministic parameter construction, mirroring idct_8x8.__init__."""
    alpha = np.array([1.0 / np.sqrt(2)] + [1.0] * 7)
    alpha_2d = np.outer(alpha, alpha).astype(np.float32)             # (8, 8)

    x = np.arange(8)
    # cxu[x, u] = cos((2u+1) * x * pi / 16)
    cxu = np.cos((2 * x[None, :] + 1) * x[:, None] * np.pi / 16)
    tensor = np.einsum("xu,yv->xyuv", cxu, cxu).astype(np.float32)   # (8,8,8,8)
    return alpha_2d, tensor


def _make_fused_weight():
    """W'[xy, uv] = 0.25 * alpha[xy] * T[xy, uv]  ->  out = img @ W' + 128."""
    alpha_2d, tensor = _make_params()
    w = tensor.reshape(64, 64)                          # contract dim first
    w_fused = 0.25 * alpha_2d.reshape(64, 1) * w        # (64, 64)
    return w_fused.astype(np.float32)


def _make_packed_weight(pack: int):
    """Block-diagonal weight: pack independent 64-point IDCTs per row."""
    w = _make_fused_weight()                            # (64, 64)
    n = 64 * pack
    w_packed = np.zeros((n, n), dtype=np.float32)
    for p in range(pack):
        w_packed[p * 64:(p + 1) * 64, p * 64:(p + 1) * 64] = w
    return w_packed


# ---------------------------------------------------------------------------
# Kernel
# ---------------------------------------------------------------------------
def _idct_kernel(img_ref, w_ref, out_ref):
    # Single MXU matmul (alpha & 0.25 folded into w), f32 accumulation, +128.
    out_ref[...] = (
        jnp.dot(img_ref[...], w_ref[...], preferred_element_type=jnp.float32)
        + 128.0
    )


def idct_8x8(image: jax.Array, *, force_pallas: bool = False) -> jax.Array:
    """image: (B, 8, 8) float32 -> (B, 8, 8) float32."""
    assert image.ndim == 3 and image.shape[1:] == (8, 8)
    b = image.shape[0]
    img_flat = image.reshape(b, 64).astype(jnp.float32)

    # Tiny batches: kernel launch overhead dwarfs the ~4 KiB of compute.
    if b < _SMALL_BATCH_THRESHOLD and not force_pallas:
        w_fused = jnp.asarray(_make_fused_weight())
        return (img_flat @ w_fused + 128.0).reshape(b, 8, 8)

    pack = _LANE_PACK
    lanes = 64 * pack                                   # 128

    # Pack `pack` blocks per row; pad rows so the tile count divides evenly.
    rows = pl.cdiv(b, pack)
    tile_rows = min(_TILE_ROWS, _round_up(rows, 8))     # sublane-aligned
    rows_padded = _round_up(rows, tile_rows)
    b_pad = rows_padded * pack

    if b_pad != b:
        img_flat = jnp.pad(img_flat, ((0, b_pad - b), (0, 0)))
    img_packed = img_flat.reshape(rows_padded, lanes)

    w_packed = jnp.asarray(_make_packed_weight(pack))   # (128, 128)

    grid = (rows_padded // tile_rows,)

    out_packed = pl.pallas_call(
        _idct_kernel,
        out_shape=jax.ShapeDtypeStruct((rows_padded, lanes), jnp.float32),
        grid_spec=pltpu.PrefetchScalarGridSpec(
            num_scalar_prefetch=0,
            grid=grid,
            in_specs=[
                pl.BlockSpec((tile_rows, lanes), lambda i: (i, 0)),
                pl.BlockSpec((lanes, lanes), lambda i: (0, 0)),
            ],
            out_specs=pl.BlockSpec((tile_rows, lanes), lambda i: (i, 0)),
        ),
        compiler_params=pltpu.CompilerParams(
            dimension_semantics=("parallel",),
        ),
    )(img_packed, w_packed)

    out_flat = out_packed.reshape(b_pad, 64)[:b]
    return out_flat.reshape(b, 8, 8)


# ---------------------------------------------------------------------------
# Pure-JAX reference mirroring the PyTorch forward exactly
# ---------------------------------------------------------------------------
def _reference(image: jax.Array) -> jax.Array:
    alpha_2d, tensor = _make_params()
    img = image * jnp.asarray(alpha_2d)
    return 0.25 * jnp.tensordot(img, jnp.asarray(tensor), axes=2) + 128.0


if __name__ == "__main__":
    key = jax.random.PRNGKey(0)

    # Small batch (forced through the Pallas path so the kernel runs).
    image_small = jax.random.normal(key, (16, 8, 8), dtype=jnp.float32) * 50.0
    out_small = jax.block_until_ready(idct_8x8(image_small, force_pallas=True))
    np.testing.assert_allclose(
        np.asarray(out_small), np.asarray(_reference(image_small)),
        rtol=1e-5, atol=1e-2)

    # Odd batch size (exercises lane packing + row padding + tiling).
    key2 = jax.random.PRNGKey(1)
    image_odd = jax.random.normal(key2, (1000, 8, 8), dtype=jnp.float32) * 50.0
    out_odd = jax.block_until_ready(idct_8x8(image_odd, force_pallas=True))
    np.testing.assert_allclose(
        np.asarray(out_odd), np.asarray(_reference(image_odd)),
        rtol=1e-5, atol=1e-2)

    print("KERNEL_OK")
</pallas_src>

<mosaic_0001>
module attributes {stable_mosaic.version = 11 : i64} {
  func.func @_idct_kernel(%arg0: i32, %arg1: memref<8x128xf32, #tpu.memory_space<vmem>>, %arg2: memref<128x128xf32, #tpu.memory_space<vmem>>, %arg3: memref<8x128xf32, #tpu.memory_space<vmem>>) attributes {dimension_semantics = [#tpu.dimension_semantics<parallel>], iteration_bounds = array<i64: 1>, scalar_prefetch = 0 : i64, scratch_operands = 0 : i64, tpu.core_type = #tpu.core_type<tc>, window_params = [{transform_indices = @transform_0, window_bounds = array<i64: 8, 128>}, {pipeline_mode = #tpu.pipeline_mode<synchronous>, transform_indices = @transform_1, window_bounds = array<i64: 128, 128>}, {transform_indices = @transform_2, window_bounds = array<i64: 8, 128>}]} {
    %c0 = arith.constant 0 : index
    %c0_0 = arith.constant 0 : index
    %0 = vector.load %arg1[%c0, %c0_0] : memref<8x128xf32, #tpu.memory_space<vmem>>, vector<8x128xf32>
    %c0_1 = arith.constant 0 : index
    %c0_2 = arith.constant 0 : index
    %1 = vector.load %arg2[%c0_1, %c0_2] : memref<128x128xf32, #tpu.memory_space<vmem>>, vector<128x128xf32>
    %cst = arith.constant dense<0.000000e+00> : vector<8x128xf32>
    %2 = tpu.matmul %0, %1, %cst {dimension_numbers = #tpu.dot_dimension_numbers<[1], [0], [0], [1], [0, 0, 1, 1], [], []>} : vector<8x128xf32>, vector<128x128xf32>, vector<8x128xf32> -> vector<8x128xf32>
    %cst_3 = arith.constant 1.280000e+02 : f32
    %3 = vector.broadcast %cst_3 : f32 to vector<8x128xf32>
    %4 = arith.addf %2, %3 : vector<8x128xf32>
    %c0_4 = arith.constant 0 : index
    %c0_5 = arith.constant 0 : index
    %5 = vector.load %arg3[%c0_4, %c0_5] : memref<8x128xf32, #tpu.memory_space<vmem>>, vector<8x128xf32>
    tpu.vector_store %arg3[%c0_4, %c0_5], %4 {strides = array<i32>} : memref<8x128xf32, #tpu.memory_space<vmem>>, vector<8x128xf32>,
    return
  }
  func.func @transform_0(%arg0: i32) -> (i32, i32) {
    %c0_i32 = arith.constant 0 : i32
    %c0_i32_0 = arith.constant 0 : i32
    return %arg0, %c0_i32 : i32, i32
  }
  func.func @transform_1(%arg0: i32) -> (i32, i32) {
    %c0_i32 = arith.constant 0 : i32
    %c0_i32_0 = arith.constant 0 : i32
    %c0_i32_1 = arith.constant 0 : i32
    return %c0_i32, %c0_i32_0 : i32, i32
  }
  func.func @transform_2(%arg0: i32) -> (i32, i32) {
    %c0_i32 = arith.constant 0 : i32
    %c0_i32_0 = arith.constant 0 : i32
    return %arg0, %c0_i32 : i32, i32
  }
}

</mosaic_0001>

<bundles_post_ra>
// kernel: tpu_custom_call.1
= control target key start
LH: loop header
LB: loop body
LE: loop exit
PB: predicated region body
PF: predicated region fallthrough
CT: control target
= control target key end

     0   :  { %7 = vsyncpa [#allocation3], 0  ;;  %s210_s0 = inlined_call_operand.hbm [shape: f32[8,128], index: 0, kind: input, shape index: {}]   ;;  %s211_s1 = inlined_call_operand.hbm [shape: f32[128,128], index: 1, kind: input, shape index: {}]   ;;  %s212_s2 = inlined_call_operand.hbm [shape: f32[8,128], index: 2, kind: output, shape index: {}]  }
   0x1   :  { %8 = vsyncpa [#allocation6], 0 }
   0x2   :  { %9 = vsyncpa [#allocation4], 0  ;;  %s15_s11 = sshll.u32 %s210_s0, 4  ;;  %s181_s12 = smov [#allocation2]   ;;  %s16_s11 = int_to_ptr.hbm [resolvable:$true] %s15_s11 }
   0x3   :  { %s17_s13 = sshll.u32 %s181_s12, 4  ;;  %s25_s16 = sshll.u32 %s211_s1, 4  ;;  %s18_s13 = int_to_ptr.vmem [resolvable:$true] %s17_s13  ;;  %s26_s16 = int_to_ptr.hbm [resolvable:$true] %s25_s16 }
   0x4   :  { %20 = dma.hbm_to_vmem [thread:$0]  %s16_s11, 128, %s18_s13, [#allocation3]  }
   0x5   :  { %s182_s17 = smov [#allocation5]   ;;  %s183_s19 = smov 128  }
   0x6   :  { %s27_s18 = sshll.u32 %s182_s17, 4  ;;  %s184_s20 = smov 8   ;;  %s28_s18 = int_to_ptr.vmem [resolvable:$true] %s27_s18 }
   0x7   :  { %33 = dma.hbm_to_vmem [thread:$0]  %s26_s16, 2048, %s28_s18, [#allocation6], %s183_s19, %s183_s19, %s184_s20  }
   0x8   :  { %175 = dma.done.wait [#allocation3], 128  }
   0x9   :  { %176 = vsyncadd [#allocation3], 4294967168 }
   0xa   :  { %177 = dma.done.wait [#allocation6], 2048  }
   0xb   :  { %178 = vsyncadd [#allocation6], 4294965248  ;;  %v58_v0 = vld [vmem:[#allocation5 + $0x78] sm:$0xff]  ;;  %v57_v1 = vld [vmem:[#allocation5 + $0x70] sm:$0xff]  ;;  %s185_s0 = smov [#allocation7]   ;;  %s87_s23 = sshll.u32 %s212_s2, 4  ;;  %s88_s23 = int_to_ptr.hbm [resolvable:$true] %s87_s23 }
   0xc   :  { %59 = vmatpush.msra.mxu0 %v58_v0  ;;  %v56_v2 = vld [vmem:[#allocation5 + $0x68] sm:$0xff]  ;;  %v55_v3 = vld [vmem:[#allocation5 + $0x60] sm:$0xff]  ;;  %v54_v4 = vld [vmem:[#allocation5 + $0x58] sm:$0xff]  ;;  %s85_s1 = sshll.u32 %s185_s0, 4  ;;  %s86_s1 = int_to_ptr.vmem [resolvable:$true] %s85_s1 }
   0xd   :  { %v53_v5 = vld [vmem:[#allocation5 + $0x50] sm:$0xff]  ;;  %v52_v6 = vld [vmem:[#allocation5 + $0x48] sm:$0xff]  ;;  %v51_v7 = vld [vmem:[#allocation5 + $0x40] sm:$0xff] }
   0xe   :  { %60 = vmatpush.msra.mxu0 %v57_v1  ;;  %v50_v8 = vld [vmem:[#allocation5 + $0x38] sm:$0xff]  ;;  %v49_v9 = vld [vmem:[#allocation5 + $0x30] sm:$0xff]  ;;  %v48_v10 = vld [vmem:[#allocation5 + $0x28] sm:$0xff] }
   0xf   :  { %v47_v11 = vld [vmem:[#allocation5 + $0x20] sm:$0xff]  ;;  %v46_v12 = vld [vmem:[#allocation5 + $0x18] sm:$0xff]  ;;  %v45_v13 = vld [vmem:[#allocation5 + $0x10] sm:$0xff] }
  0x10   :  { %61 = vmatpush.msra.mxu0 %v56_v2  ;;  %v44_v14 = vld [vmem:[#allocation5 + $0x8] sm:$0xff]  ;;  %v43_v15 = vld [vmem:[#allocation5] sm:$0xff]  ;;  %v42_v16 = vld [vmem:[#allocation2] sm:$0xff] }
  0x12   :  { %62 = vmatpush.msra.mxu0 %v55_v3 }
  0x14   :  { %63 = vmatpush.msra.mxu0 %v54_v4 }
  0x16   :  { %64 = vmatpush.msra.mxu0 %v53_v5 }
  0x18   :  { %65 = vmatpush.msra.mxu0 %v52_v6 }
  0x1a   :  { %66 = vmatpush.msra.mxu0 %v51_v7 }
  0x1c   :  { %67 = vmatpush.msra.mxu0 %v50_v8 }
  0x1e   :  { %68 = vmatpush.msra.mxu0 %v49_v9 }
  0x20   :  { %69 = vmatpush.msra.mxu0 %v48_v10 }
  0x22   :  { %70 = vmatpush.msra.mxu0 %v47_v11 }
  0x24   :  { %71 = vmatpush.msra.mxu0 %v46_v12 }
  0x26   :  { %72 = vmatpush.msra.mxu0 %v45_v13 }
  0x28   :  { %73 = vmatpush.msra.mxu0 %v44_v14 }
  0x2a   :  { %74 = vmatpush.msra.mxu0 %v43_v15 }
  0x2b   :  { %75 = vmatmul.f32.vlgmr.msra.gmra.mxu0 %v42_v16 }
  0xa8   :  { %v76_v17 = vpop.f32.mrf.mxu0 }
  0xa9   :  { %v77_v18 = vadd.f32 128.0, %v76_v17 }
  0xab   :  { %79 = vst [vmem:[#allocation7] sm:$0xff] %v77_v18 }
  0xac   :  { %90 = dma.vmem_to_hbm [thread:$0]  %s86_s1, 128, %s88_s23, [#allocation4]  }
  0xad   :  { %179 = dma.done.wait [#allocation4], 128  }
  0xae   :  { %180 = vsyncadd [#allocation4], 4294967168 }
  0xaf   :  { %95 = vsyncpa [#allocation3], 1 }
  0xb0   :  { %96 = vsyncpa [#allocation6], 1 }
  0xb1   :  { %97 = vsyncpa [#allocation4], 1 }

</bundles_post_ra>
